<compile_context>
chip_gen: v7x
topology: tpu7x:2x2x1
jax: 0.10.0
libtpu: 0.0.40
codegen_flags: <defaults>
</compile_context>

<pallas_src>
import functools
import math

import jax
import jax.numpy as jnp
from jax.experimental import pallas as pl
from jax.experimental.pallas import tpu as pltpu

LANE = 128            # lane (fast) axis width of a vreg
SUBLANE = 8           # sublane granularity
MAX_TILE_ROWS = 2048  # 2048 x 128 x 4 B = 1 MiB per f32 buffer
_K_UNIFORM = 4        # uniforms summed per Gaussian sample (Irwin-Hall)
_GOLDEN_I32 = 0x9E3779B1 - (1 << 32)  # odd golden-ratio constant as int32


# ----------------------------------------------------------------------------
# Pallas kernel: out = x + N(0, 1) * std + mean
# Noise = centred Irwin-Hall sum of K uniforms built from in-kernel random bits.
# ----------------------------------------------------------------------------
def _add_noise_kernel(seed_ref, x_ref, o_ref, *, mean, std, tile_rows, use_hw_prng):
    shape = x_ref.shape            # (TR, 128) lane-dense tile
    tile = pl.program_id(0)

    if use_hw_prng:
        # Real TPU: hardware PRNG.  Mix the tile id with an odd constant so
        # per-tile streams are decorrelated (not adjacent integer seeds).
        pltpu.prng_seed(seed_ref[0] ^ (tile * _GOLDEN_I32))

        def draw_u23(k):
            del k  # the stateful PRNG advances on every call
            bits = pltpu.prng_random_bits(shape)
            if bits.dtype != jnp.int32:
                bits = pltpu.bitcast(bits, jnp.int32)
            # 23 low bits -> exact int-to-float convert, uniform in [0, 2^23).
            return jnp.bitwise_and(bits, 0x7FFFFF).astype(jnp.float32)
    else:
        # Interpreter / non-TPU fallback: counter-based splitmix32-style hash
        # (pure jnp, runs anywhere, deterministic in seed + element index).
        row = jax.lax.broadcasted_iota(jnp.uint32, shape, 0)
        col = jax.lax.broadcasted_iota(jnp.uint32, shape, 1)
        off = (tile * tile_rows).astype(jnp.uint32)
        idx = (row + off) * jnp.uint32(shape[1]) + col
        seed_u = seed_ref[0].astype(jnp.uint32) * jnp.uint32(0x9E3779B9)

        def draw_u23(k):
            z = idx * jnp.uint32(_K_UNIFORM) + jnp.uint32(k) + seed_u
            z = (z ^ (z >> 16)) * jnp.uint32(0x7FEB352D)
            z = (z ^ (z >> 15)) * jnp.uint32(0x846CA68B)
            z = z ^ (z >> 16)
            return (z >> 9).astype(jnp.float32)   # uniform in [0, 2^23)

    # Centred Irwin-Hall: (u0 + u1) - (u2 + u3).  Exactly zero mean, variance
    # K/12 (in units of 2^46) -> one scale multiply gives N(0, std^2)-like noise.
    # Pure VALU work, no EUP transcendentals.
    acc = draw_u23(0)
    for k in range(1, _K_UNIFORM):
        u = draw_u23(k)
        acc = acc + u if k < _K_UNIFORM // 2 else acc - u

    scale = float(std) * math.sqrt(12.0 / _K_UNIFORM) / float(1 << 23)
    res = x_ref[...].astype(jnp.float32) + acc * scale
    if float(mean) != 0.0:             # statically skip the add for the default
        res = res + float(mean)
    o_ref[...] = res.astype(o_ref.dtype)


# ----------------------------------------------------------------------------
# Wrapper: flatten to a lane-dense (rows, 128) slab, tile rows, call the kernel
# ----------------------------------------------------------------------------
def add_gaussian_noise_forward(x, seed, mean=0.0, std=0.1):
    """Equivalent of AddGaussianNoise.forward: x -> x + randn(x.shape)*std + mean.

    `seed` is an int32 seed (replaces torch's global RNG stream)."""
    if not jnp.issubdtype(x.dtype, jnp.floating):
        raise ValueError("AddGaussianNoise expects a floating-point tensor")

    orig_shape = x.shape
    n = 1
    for s in orig_shape:
        n *= int(s)

    # --- static tiling arithmetic (Python side) -----------------------------
    rows = pl.cdiv(n, LANE)
    padded_rows = ((rows + SUBLANE - 1) // SUBLANE) * SUBLANE   # multiple of 8 only
    # Large contiguous tiles, but keep >= 2 grid steps when possible so the
    # "parallel" axis can use the second v7x TensorCore.
    half = pl.cdiv(padded_rows, 2)
    half = ((half + SUBLANE - 1) // SUBLANE) * SUBLANE
    tile_rows = max(SUBLANE, min(MAX_TILE_ROWS, half))
    grid = (pl.cdiv(padded_rows, tile_rows),)
    total = padded_rows * LANE

    # --- reshape to lane-dense slab ------------------------------------------
    xf = jnp.ravel(x)
    if total != n:
        # TODO(synk): the ragged tail could be masked in-kernel instead; the
        # pad/slice extra HBM pass only happens when numel % 128 != 0.
        xf = jnp.pad(xf, (0, total - n))
    x2 = xf.reshape(padded_rows, LANE)

    seed_arr = jnp.asarray([seed], dtype=jnp.int32)
    use_hw_prng = jax.default_backend() == "tpu"

    out2 = pl.pallas_call(
        functools.partial(
            _add_noise_kernel,
            mean=float(mean),
            std=float(std),
            tile_rows=tile_rows,
            use_hw_prng=use_hw_prng,
        ),
        out_shape=jax.ShapeDtypeStruct((padded_rows, LANE), x.dtype),
        grid=grid,
        in_specs=[
            pl.BlockSpec(memory_space=pltpu.MemorySpace.SMEM),   # seed scalar
            pl.BlockSpec((tile_rows, LANE), lambda i: (i, 0)),   # x tile
        ],
        out_specs=pl.BlockSpec((tile_rows, LANE), lambda i: (i, 0)),
        compiler_params=pltpu.CompilerParams(
            dimension_semantics=("parallel",),
        ),
    )(seed_arr, x2)

    out_flat = out2.reshape(-1)
    if total != n:
        out_flat = out_flat[:n]
    return out_flat.reshape(orig_shape)


if __name__ == "__main__":
    key = jax.random.PRNGKey(0)
    kx, _ = jax.random.split(key)

    # Video-shaped input consistent with the module: (T=2, C=4, H=16, W=16)
    x = jax.random.uniform(kx, (2, 4, 16, 16), dtype=jnp.float32)

    # TODO(synk): torch's global RNG stream cannot be reproduced bit-exactly;
    # the Gaussian noise is drawn from this seed by the in-kernel generator.
    seed = 123456789

    out = add_gaussian_noise_forward(x, seed, mean=0.0, std=0.1)
    out = jax.block_until_ready(out)

    assert out.shape == x.shape and out.dtype == x.dtype
    assert bool(jnp.all(jnp.isfinite(out)))

    # Sanity-check the injected noise statistics: ~N(0, 0.1)
    resid = out - x
    assert abs(float(jnp.mean(resid))) < 0.05
    assert 0.02 < float(jnp.std(resid)) < 0.5

    print("KERNEL_OK")
</pallas_src>

<mosaic_0001>
module attributes {stable_mosaic.version = 11 : i64} {
  func.func @_add_noise_kernel(%arg0: i32, %arg1: memref<1xi32, #tpu.memory_space<smem>>, %arg2: memref<8x128xf32, #tpu.memory_space<vmem>>, %arg3: memref<8x128xf32, #tpu.memory_space<vmem>>) attributes {dimension_semantics = [#tpu.dimension_semantics<parallel>], iteration_bounds = array<i64: 2>, scalar_prefetch = 0 : i64, scratch_operands = 0 : i64, tpu.core_type = #tpu.core_type<tc>, window_params = [{transform_indices = @transform_0, window_bounds = array<i64: 1>}, {transform_indices = @transform_1, window_bounds = array<i64: 8, 128>}, {transform_indices = @transform_2, window_bounds = array<i64: 8, 128>}]} {
    %0 = tpu.iota {dimensions = array<i32: 0>} : vector<8x128xi32>
    %1 = tpu.iota {dimensions = array<i32: 1>} : vector<8x128xi32>
    %c8_i32 = arith.constant 8 : i32
    %2 = arith.muli %arg0, %c8_i32 : i32
    %3 = vector.broadcast %2 : i32 to vector<8x128xi32>
    %4 = arith.addi %0, %3 : vector<8x128xi32>
    %c128_i32 = arith.constant 128 : i32
    %5 = vector.broadcast %c128_i32 : i32 to vector<8x128xi32>
    %6 = arith.muli %4, %5 : vector<8x128xi32>
    %7 = arith.addi %6, %1 : vector<8x128xi32>
    %c0 = arith.constant 0 : index
    %8 = memref.load %arg1[%c0] : memref<1xi32, #tpu.memory_space<smem>>
    %c-1640531527_i32 = arith.constant -1640531527 : i32
    %9 = arith.muli %8, %c-1640531527_i32 : i32
    %c4_i32 = arith.constant 4 : i32
    %10 = vector.broadcast %c4_i32 : i32 to vector<8x128xi32>
    %11 = arith.muli %7, %10 : vector<8x128xi32>
    %c0_i32 = arith.constant 0 : i32
    %12 = vector.broadcast %c0_i32 : i32 to vector<8x128xi32>
    %13 = arith.addi %11, %12 : vector<8x128xi32>
    %14 = vector.broadcast %9 : i32 to vector<8x128xi32>
    %15 = arith.addi %13, %14 : vector<8x128xi32>
    %c16_i32 = arith.constant 16 : i32
    %16 = vector.broadcast %c16_i32 : i32 to vector<8x128xi32>
    %17 = arith.shrui %15, %16 : vector<8x128xi32>
    %18 = arith.xori %15, %17 : vector<8x128xi32>
    %c2146121005_i32 = arith.constant 2146121005 : i32
    %19 = vector.broadcast %c2146121005_i32 : i32 to vector<8x128xi32>
    %20 = arith.muli %18, %19 : vector<8x128xi32>
    %c15_i32 = arith.constant 15 : i32
    %21 = vector.broadcast %c15_i32 : i32 to vector<8x128xi32>
    %22 = arith.shrui %20, %21 : vector<8x128xi32>
    %23 = arith.xori %20, %22 : vector<8x128xi32>
    %c-2073254261_i32 = arith.constant -2073254261 : i32
    %24 = vector.broadcast %c-2073254261_i32 : i32 to vector<8x128xi32>
    %25 = arith.muli %23, %24 : vector<8x128xi32>
    %c16_i32_0 = arith.constant 16 : i32
    %26 = vector.broadcast %c16_i32_0 : i32 to vector<8x128xi32>
    %27 = arith.shrui %25, %26 : vector<8x128xi32>
    %28 = arith.xori %25, %27 : vector<8x128xi32>
    %c9_i32 = arith.constant 9 : i32
    %29 = vector.broadcast %c9_i32 : i32 to vector<8x128xi32>
    %30 = arith.shrui %28, %29 : vector<8x128xi32>
    %31 = arith.uitofp %30 : vector<8x128xi32> to vector<8x128xf32>
    %c4_i32_1 = arith.constant 4 : i32
    %32 = vector.broadcast %c4_i32_1 : i32 to vector<8x128xi32>
    %33 = arith.muli %7, %32 : vector<8x128xi32>
    %c1_i32 = arith.constant 1 : i32
    %34 = vector.broadcast %c1_i32 : i32 to vector<8x128xi32>
    %35 = arith.addi %33, %34 : vector<8x128xi32>
    %36 = vector.broadcast %9 : i32 to vector<8x128xi32>
    %37 = arith.addi %35, %36 : vector<8x128xi32>
    %c16_i32_2 = arith.constant 16 : i32
    %38 = vector.broadcast %c16_i32_2 : i32 to vector<8x128xi32>
    %39 = arith.shrui %37, %38 : vector<8x128xi32>
    %40 = arith.xori %37, %39 : vector<8x128xi32>
    %c2146121005_i32_3 = arith.constant 2146121005 : i32
    %41 = vector.broadcast %c2146121005_i32_3 : i32 to vector<8x128xi32>
    %42 = arith.muli %40, %41 : vector<8x128xi32>
    %c15_i32_4 = arith.constant 15 : i32
    %43 = vector.broadcast %c15_i32_4 : i32 to vector<8x128xi32>
    %44 = arith.shrui %42, %43 : vector<8x128xi32>
    %45 = arith.xori %42, %44 : vector<8x128xi32>
    %c-2073254261_i32_5 = arith.constant -2073254261 : i32
    %46 = vector.broadcast %c-2073254261_i32_5 : i32 to vector<8x128xi32>
    %47 = arith.muli %45, %46 : vector<8x128xi32>
    %c16_i32_6 = arith.constant 16 : i32
    %48 = vector.broadcast %c16_i32_6 : i32 to vector<8x128xi32>
    %49 = arith.shrui %47, %48 : vector<8x128xi32>
    %50 = arith.xori %47, %49 : vector<8x128xi32>
    %c9_i32_7 = arith.constant 9 : i32
    %51 = vector.broadcast %c9_i32_7 : i32 to vector<8x128xi32>
    %52 = arith.shrui %50, %51 : vector<8x128xi32>
    %53 = arith.uitofp %52 : vector<8x128xi32> to vector<8x128xf32>
    %54 = arith.addf %31, %53 : vector<8x128xf32>
    %c4_i32_8 = arith.constant 4 : i32
    %55 = vector.broadcast %c4_i32_8 : i32 to vector<8x128xi32>
    %56 = arith.muli %7, %55 : vector<8x128xi32>
    %c2_i32 = arith.constant 2 : i32
    %57 = vector.broadcast %c2_i32 : i32 to vector<8x128xi32>
    %58 = arith.addi %56, %57 : vector<8x128xi32>
    %59 = vector.broadcast %9 : i32 to vector<8x128xi32>
    %60 = arith.addi %58, %59 : vector<8x128xi32>
    %c16_i32_9 = arith.constant 16 : i32
    %61 = vector.broadcast %c16_i32_9 : i32 to vector<8x128xi32>
    %62 = arith.shrui %60, %61 : vector<8x128xi32>
    %63 = arith.xori %60, %62 : vector<8x128xi32>
    %c2146121005_i32_10 = arith.constant 2146121005 : i32
    %64 = vector.broadcast %c2146121005_i32_10 : i32 to vector<8x128xi32>
    %65 = arith.muli %63, %64 : vector<8x128xi32>
    %c15_i32_11 = arith.constant 15 : i32
    %66 = vector.broadcast %c15_i32_11 : i32 to vector<8x128xi32>
    %67 = arith.shrui %65, %66 : vector<8x128xi32>
    %68 = arith.xori %65, %67 : vector<8x128xi32>
    %c-2073254261_i32_12 = arith.constant -2073254261 : i32
    %69 = vector.broadcast %c-2073254261_i32_12 : i32 to vector<8x128xi32>
    %70 = arith.muli %68, %69 : vector<8x128xi32>
    %c16_i32_13 = arith.constant 16 : i32
    %71 = vector.broadcast %c16_i32_13 : i32 to vector<8x128xi32>
    %72 = arith.shrui %70, %71 : vector<8x128xi32>
    %73 = arith.xori %70, %72 : vector<8x128xi32>
    %c9_i32_14 = arith.constant 9 : i32
    %74 = vector.broadcast %c9_i32_14 : i32 to vector<8x128xi32>
    %75 = arith.shrui %73, %74 : vector<8x128xi32>
    %76 = arith.uitofp %75 : vector<8x128xi32> to vector<8x128xf32>
    %77 = arith.subf %54, %76 : vector<8x128xf32>
    %c4_i32_15 = arith.constant 4 : i32
    %78 = vector.broadcast %c4_i32_15 : i32 to vector<8x128xi32>
    %79 = arith.muli %7, %78 : vector<8x128xi32>
    %c3_i32 = arith.constant 3 : i32
    %80 = vector.broadcast %c3_i32 : i32 to vector<8x128xi32>
    %81 = arith.addi %79, %80 : vector<8x128xi32>
    %82 = vector.broadcast %9 : i32 to vector<8x128xi32>
    %83 = arith.addi %81, %82 : vector<8x128xi32>
    %c16_i32_16 = arith.constant 16 : i32
    %84 = vector.broadcast %c16_i32_16 : i32 to vector<8x128xi32>
    %85 = arith.shrui %83, %84 : vector<8x128xi32>
    %86 = arith.xori %83, %85 : vector<8x128xi32>
    %c2146121005_i32_17 = arith.constant 2146121005 : i32
    %87 = vector.broadcast %c2146121005_i32_17 : i32 to vector<8x128xi32>
    %88 = arith.muli %86, %87 : vector<8x128xi32>
    %c15_i32_18 = arith.constant 15 : i32
    %89 = vector.broadcast %c15_i32_18 : i32 to vector<8x128xi32>
    %90 = arith.shrui %88, %89 : vector<8x128xi32>
    %91 = arith.xori %88, %90 : vector<8x128xi32>
    %c-2073254261_i32_19 = arith.constant -2073254261 : i32
    %92 = vector.broadcast %c-2073254261_i32_19 : i32 to vector<8x128xi32>
    %93 = arith.muli %91, %92 : vector<8x128xi32>
    %c16_i32_20 = arith.constant 16 : i32
    %94 = vector.broadcast %c16_i32_20 : i32 to vector<8x128xi32>
    %95 = arith.shrui %93, %94 : vector<8x128xi32>
    %96 = arith.xori %93, %95 : vector<8x128xi32>
    %c9_i32_21 = arith.constant 9 : i32
    %97 = vector.broadcast %c9_i32_21 : i32 to vector<8x128xi32>
    %98 = arith.shrui %96, %97 : vector<8x128xi32>
    %99 = arith.uitofp %98 : vector<8x128xi32> to vector<8x128xf32>
    %100 = arith.subf %77, %99 : vector<8x128xf32>
    %c0_22 = arith.constant 0 : index
    %c0_23 = arith.constant 0 : index
    %101 = vector.load %arg2[%c0_22, %c0_23] : memref<8x128xf32, #tpu.memory_space<vmem>>, vector<8x128xf32>
    %cst = arith.constant 2.06476543E-8 : f32
    %102 = vector.broadcast %cst : f32 to vector<8x128xf32>
    %103 = arith.mulf %100, %102 : vector<8x128xf32>
    %104 = arith.addf %101, %103 : vector<8x128xf32>
    %c0_24 = arith.constant 0 : index
    %c0_25 = arith.constant 0 : index
    %105 = vector.load %arg3[%c0_24, %c0_25] : memref<8x128xf32, #tpu.memory_space<vmem>>, vector<8x128xf32>
    tpu.vector_store %arg3[%c0_24, %c0_25], %104 {strides = array<i32>} : memref<8x128xf32, #tpu.memory_space<vmem>>, vector<8x128xf32>,
    return
  }
  func.func @transform_0(%arg0: i32) -> i32 {
    %c0_i32 = arith.constant 0 : i32
    %c0_i32_0 = arith.constant 0 : i32
    return %c0_i32 : i32
  }
  func.func @transform_1(%arg0: i32) -> (i32, i32) {
    %c0_i32 = arith.constant 0 : i32
    %c0_i32_0 = arith.constant 0 : i32
    return %arg0, %c0_i32 : i32, i32
  }
  func.func @transform_2(%arg0: i32) -> (i32, i32) {
    %c0_i32 = arith.constant 0 : i32
    %c0_i32_0 = arith.constant 0 : i32
    return %arg0, %c0_i32 : i32, i32
  }
}

</mosaic_0001>

<bundles_post_ra>
// kernel: tpu_custom_call.1
= control target key start
LH: loop header
LB: loop body
LE: loop exit
PB: predicated region body
PF: predicated region fallthrough
CT: control target
= control target key end

     0   :  { %s677_s0 = inlined_call_operand.<no memory space> [shape: s32[1], index: 0, kind: input, shape index: {}]   ;;  %s678_s1 = inlined_call_operand.hbm [shape: f32[16,128], index: 1, kind: input, shape index: {}]   ;;  %s679_s2 = inlined_call_operand.hbm [shape: f32[16,128], index: 2, kind: output, shape index: {}]  }
   0x1   :  { %7 = sst [smem:[#allocation2]] %s677_s0 }
   0x2   :  { %8 = vsyncpa [#allocation4], 0 }
   0x3   :  { %10 = vsyncpa [#allocation4 + $0x1], 0 }
   0x4   :  { %11 = vsyncpa [#allocation5], 0 }
   0x5   :  { %13 = vsyncpa [#allocation5 + $0x1], 0  ;;  %s508_s11 = smov 0   ;;  %s510_s12 = smov 0  }
   0x6   :  { %s512_s13 = smov 0   ;;  %s514_s14 = smov 0  }
   0x7 LB: > { %s529_s0 = sadd.s32 4294967295, %s486_s14   ;;  %s331_s15 = sadd.s32 4294967294, %s486_s14   ;;  %s486_s14 = sphi %s514_s14, %s694_s14   ;;  %s482_s13 = sphi %s512_s13, %s693_s13   ;;  %s478_s12 = sphi %s510_s12, %s692_s12   ;;  %s474_s11 = sphi %s508_s11, %s691_s11  }
   0x8   : > { %s533_s16 = sadd.s32 1, %s486_s14   ;;  %s47_s17 = sadd.s32 1, %s482_s13 }
   0x9   : > { %s44_s18 = ssub.s32 %s486_s14, %s533_s16  ;;  %p54_p0 = scmp.ne.s32.totalorder %s482_s13, %s478_s12 }
   0xa   : > { %p45_p1 = scmp.eq.s32.totalorder %s44_s18, 0  ;;  %p55_p2 = scmp.eq.s32.totalorder %s486_s14, 0 }
   0xb   : > { %p60_p3 = scmp.ne.s32.totalorder %s478_s12, %s474_s11  ;;  %p61_p4 = scmp.eq.s32.totalorder %s529_s0, 0 }
   0xc   : > { %s545_s19 = scalar_select %p45_p1, %s482_s13, %s47_s17  }
   0xd   : > { %p547_p5 = por %p55_p2, %p54_p0  ;;  %p551_p6 = por %p61_p4, %p60_p3 }
   0xe   : > { %p84_p7 = scmp.eq.s32.totalorder %s529_s0, 1  ;;  %p90_p8 = scmp.eq.s32.totalorder %s331_s15, 1 }
   0xf   : > { %p356_p10 = scmp.lt.s32.totalorder %s486_s14, 2  ;;  %s113_s24 = sand.u32 1, %s482_s13  }
  0x10   : > { %p558_p11 = por %p84_p7, %p54_p0  ;;  %p562_p12 = por %p90_p8, %p60_p3 }
  0x11   : > { %s335_s25 = sshll.u32 %s486_s14, 7  ;;  %s334_s26 = sshll.u32 %s113_s24, 3 }
  0x12   : > { %s683_s22 = scalar_select %p558_p11, 1, 0 }
  0x13   : > { %s684_s23 = scalar_select %p562_p12, 1, 0 }
  0x14   : > { %s571_s29 = scalar_lea.hbm %s678_s1, %s335_s25  ;;  %s117_s30 = scalar_lea.vmem [#allocation3], %s334_s26 }
  0x15   : > { %s124_s3 = sshll.u32 %s117_s30, 4  ;;  %p575_p13 = pnand %p356_p10, %p547_p5  ;;  %s579_s3 = int_to_ptr.vmem [resolvable:$true] %s124_s3 }
  0x16   : > { %s114_s5 = scalar_lea.sflag [#allocation4], %s113_s24  ;;  %s390_s6 = scalar_lea.hbm %s571_s29, 128 }
  0x17   : > { %p391_p2 = scmp.ne.s32.totalorder %s571_s29, %s390_s6  ;;  %p392_p3 = pneg %p575_p13 }
  0x18   : > { %s395_s9 = scalar_lea.hbm %s678_s1, 256  ;;  %p396_p5 = scmp.lt.u32.totalorder %s571_s29, %s678_s1 }
  0x19   : > { %p393_p4 = pnand %p392_p3, %p391_p2  ;;  %p397_p8 = scmp.lt.u32.totalorder %s395_s9, %s390_s6 }
  0x1a   : > { %p399_p9 = scmp.lt.u32.totalorder %s390_s6, %s571_s29 }
  0x1b   : > { %p394_p7 = pneg %p393_p4  ;;  %p398_p10 = por %p397_p8, %p396_p5 }
  0x1d   : > { %p400_p0 = por %p399_p9, %p398_p10 }
  0x1f   : > { %p401_p1 = pnand %p400_p0, %p394_p7 }
  0x21   : > { %404 = shalt.err (!%p401_p1)
}
  0x22   : > { %s405_s17 = scalar_lea.vmem %s579_s3, 128  ;;  %s488_s18 = smov [#allocation3]  }
  0x23   : > { %p406_p2 = scmp.ne.s32.totalorder %s579_s3, %s405_s17  ;;  %s410_s20 = sshll.u32 %s488_s18, 4  ;;  %s411_s20 = int_to_ptr.vmem [resolvable:$false] %s410_s20 }
  0x24   : > { %s412_s24 = scalar_lea.vmem %s411_s20, 256  ;;  %p413_p11 = scmp.lt.s32.totalorder %s579_s3, %s411_s20 }
  0x25   : > { %p408_p4 = pnand %p406_p2, %p392_p3  ;;  %p414_p5 = scmp.lt.s32.totalorder %s412_s24, %s405_s17 }
  0x27   : > { %p409_p12 = pneg %p408_p4  ;;  %p415_p8 = por %p414_p5, %p413_p11 }
  0x29   : > { %p416_p9 = pnand %p415_p8, %p409_p12 }
  0x2b   : > { %419 = shalt.err (!%p416_p9)
}
  0x2c   : > { %351 = dma.hbm_to_vmem [thread:$0]  (!%p575_p13), %s571_s29, 128, %s579_s3, %s114_s5  }
  0x2d   : > { %p686_p0 = scmp.lt.s32.totalorder %s486_s14, 3  ;;  %p687_p1 = scmp.ge.s32.totalorder %s486_s14, 1 }
  0x2f   : > { %p130_p3 = pnand %p687_p1, %p686_p0 }
  0x30   : > { %s613_s25 = sand.u32 (!%p130_p3), 1, %s478_s12  }
  0x31   : > { %133 = sbr.rel (%p130_p3) target bundleno = 123 (0x7b), region = 28  ;;  %s337_s26 = sshll.u32 (!%p130_p3), %s613_s25, 3 }
  0x32   : > { %s136_s27 = scalar_lea.sflag (!%p130_p3), [#allocation4], %s613_s25  ;;  %s619_s28 = scalar_lea.vmem (!%p130_p3), [#allocation3], %s337_s26 }
  0x38   : > { %465 = dma.done.wait (%p551_p6), %s136_s27, 128  }
  0x39   : > { %467 = vsyncadd (%p551_p6), %s136_s27, 4294967168  ;;  %v160_v0 = vlaneseq  ;;  %s339_s29 = sshll.u32 %s529_s0, 3  ;;  %s169_s30 = sld [smem:[#allocation2]] }
  0x3a   : > { %v165_v1 = vstv %s339_s29  ;;  %s159_s21 = scalar_lea.vmem [#allocation6], %s337_s26  ;;  %s341_s5 = sshll.u32 %s529_s0, 7 }
  0x3b   : > { %v161_v2 = vshrl.u32 %v160_v0, 7  ;;  %v163_v3 = vand.u32 127, %v160_v0  ;;  %s261_s4 = sshll.u32 %s159_s21, 4  ;;  %s635_s8 = scalar_lea.hbm %s679_s2, %s341_s5  ;;  %s630_s4 = int_to_ptr.vmem [resolvable:$true] %s261_s4 }
  0x3c   : > { %s248_s9 = scalar_lea.sflag [#allocation5], %s613_s25  ;;  %s420_s10 = scalar_lea.vmem %s630_s4, 128 }
  0x3d   : > { %v166_v4 = vadd.s32 %v165_v1, %v161_v2  ;;  %p421_p6 = scmp.ne.s32.totalorder %s630_s4, %s420_s10  ;;  %p688_p11 = scmp.ne.s32.totalorder %s683_s22, 0 }
  0x3e   : > { %s489_s0 = smov [#allocation6]  }
  0x3f   : > { %v167_v5 = vmul.u32 128, %v166_v4  ;;  %s170_s3 = smul.u32 2654435769, %s169_s30  ;;  %p422_p12 = pnand %p421_p6, %p688_p11 }
  0x40   : > { %s424_s15 = sshll.u32 %s489_s0, 4  ;;  %s425_s15 = int_to_ptr.vmem [resolvable:$false] %s424_s15 }
  0x41   : > { %v168_v6 = vadd.s32 %v167_v5, %v163_v3  ;;  %v172_v7 = vstv %s170_s3  ;;  %p423_p13 = pneg %p422_p12  ;;  %s426_s17 = scalar_lea.vmem %s425_s15, 256 }
  0x42   : > { %p427_p7 = scmp.lt.s32.totalorder %s630_s4, %s425_s15  ;;  %p428_p10 = scmp.lt.s32.totalorder %s426_s17, %s420_s10 }
  0x43   : > { %v171_v8 = vmul.u32 4, %v168_v6 }
  0x44   : > { %p429_p2 = por %p428_p10, %p427_p7 }
  0x45   : > { %v173_v9 = vadd.s32 %v172_v7, %v171_v8  ;;  %v189_v10 = vadd.s32 1, %v171_v8  ;;  %v207_v11 = vadd.s32 2, %v171_v8  ;;  %v225_v12 = vadd.s32 3, %v171_v8 }
  0x46   : > { %p430_p4 = pnand %p429_p2, %p423_p13 }
  0x47   : > { %v174_v13 = vshrl.u32 %v173_v9, 16  ;;  %v190_v14 = vadd.s32 %v189_v10, %v172_v7  ;;  %v208_v15 = vadd.s32 %v207_v11, %v172_v7  ;;  %v226_v16 = vadd.s32 %v225_v12, %v172_v7 }
  0x49   : > { %v175_v17 = vxor.u32 %v174_v13, %v173_v9  ;;  %v191_v18 = vshrl.u32 %v190_v14, 16  ;;  %v209_v19 = vshrl.u32 %v208_v15, 16  ;;  %v227_v20 = vshrl.u32 %v226_v16, 16 }
  0x4b   : > { %v176_v21 = vmul.u32 2146121005, %v175_v17  ;;  %v192_v22 = vxor.u32 %v191_v18, %v190_v14  ;;  %v210_v23 = vxor.u32 %v209_v19, %v208_v15  ;;  %v228_v24 = vxor.u32 %v227_v20, %v226_v16  ;;  %v243_v15 = vld [vmem:[%s619_s28] sm:$0xff] }
  0x4d   : > { %v177_v25 = vshrl.u32 %v176_v21, 15  ;;  %v193_v26 = vmul.u32 2146121005, %v192_v22  ;;  %v211_v27 = vmul.u32 2146121005, %v210_v23 }
  0x4e   : > { %v229_v28 = vmul.u32 2146121005, %v228_v24 }
  0x4f   : > { %v178_v29 = vxor.u32 %v177_v25, %v176_v21  ;;  %v194_v30 = vshrl.u32 %v193_v26, 15  ;;  %v212_v31 = vshrl.u32 %v211_v27, 15 }
  0x50   : > { %v230_v32 = vshrl.u32 %v229_v28, 15 }
  0x51   : > { %v179_v33 = vmul.u32 2221713035, %v178_v29  ;;  %v195_v34 = vxor.u32 %v194_v30, %v193_v26  ;;  %v213_v35 = vxor.u32 %v212_v31, %v211_v27 }
  0x52   : > { %v231_v36 = vxor.u32 %v230_v32, %v229_v28 }
  0x53   : > { %v180_v37 = vshrl.u32 %v179_v33, 16  ;;  %v196_v38 = vmul.u32 2221713035, %v195_v34  ;;  %v214_v39 = vmul.u32 2221713035, %v213_v35 }
  0x54   : > { %v232_v40 = vmul.u32 2221713035, %v231_v36 }
  0x55   : > { %v181_v41 = vxor.u32 %v180_v37, %v179_v33  ;;  %v197_v42 = vshrl.u32 %v196_v38, 16  ;;  %v215_v43 = vshrl.u32 %v214_v39, 16 }
  0x56   : > { %v233_v44 = vshrl.u32 %v232_v40, 16 }
  0x57   : > { %v198_v45 = vxor.u32 %v197_v42, %v196_v38  ;;  %v182_v46 = vshrl.u32 %v181_v41, 9  ;;  %v216_v47 = vxor.u32 %v215_v43, %v214_v39 }
  0x58   : > { %v234_v48 = vxor.u32 %v233_v44, %v232_v40 }
  0x59   : > { %v183_v49 = vshrl.u32 %v182_v46, 16  ;;  %v184_v50 = vand.u32 65535, %v182_v46  ;;  %v199_v51 = vshrl.u32 %v198_v45, 9  ;;  %v217_v52 = vshrl.u32 %v216_v47, 9 }
  0x5a   : > { %v235_v53 = vshrl.u32 %v234_v48, 9 }
  0x5b   : > { %v185_v54 = vcvt.s32.f32 %v183_v49  ;;  %v187_v55 = vcvt.s32.f32 %v184_v50  ;;  %v200_v56 = vshrl.u32 %v199_v51, 16  ;;  %v201_v57 = vand.u32 65535, %v199_v51 }
  0x5c   : > { %v218_v58 = vshrl.u32 %v217_v52, 16  ;;  %v219_v59 = vand.u32 65535, %v217_v52  ;;  %v236_v60 = vshrl.u32 %v235_v53, 16  ;;  %v237_v61 = vand.u32 65535, %v235_v53 }
  0x5d   : > { %v186_v62 = vmul.f32 65536.0, %v185_v54  ;;  %v202_v63 = vcvt.s32.f32 %v200_v56  ;;  %v204_v0 = vcvt.s32.f32 %v201_v57 }
  0x5e   : > { %v220_v1 = vcvt.s32.f32 %v218_v58  ;;  %v222_v2 = vcvt.s32.f32 %v219_v59  ;;  %v238_v3 = vcvt.s32.f32 %v236_v60  ;;  %v240_v6 = vcvt.s32.f32 %v237_v61 }
  0x5f   : > { %v188_v4 = vadd.f32 %v187_v55, %v186_v62  ;;  %v203_v5 = vmul.f32 65536.0, %v202_v63 }
  0x60   : > { %v221_v7 = vmul.f32 65536.0, %v220_v1  ;;  %v239_v8 = vmul.f32 65536.0, %v238_v3 }
  0x61   : > { %v205_v9 = vadd.f32 %v204_v0, %v203_v5 }
  0x62   : > { %v223_v10 = vadd.f32 %v222_v2, %v221_v7  ;;  %v241_v12 = vadd.f32 %v240_v6, %v239_v8 }
  0x63   : > { %v206_v11 = vadd.f32 %v205_v9, %v188_v4 }
  0x65   : > { %v224_v13 = vsub.f32 %v206_v11, %v223_v10 }
  0x67   : > { %v242_v14 = vsub.f32 %v224_v13, %v241_v12 }
  0x69   : > { %v244_v16 = vmul.f32 2.0647654e-08, %v242_v14 }
  0x6b   : > { %v245_v17 = vadd.f32 %v244_v16, %v243_v15 }
  0x6d   : > { %246 = vst [vmem:[%s159_s21] sm:$0xff] %v245_v17 }
  0x6e   : > { %433 = shalt.err (!%p430_p4)
}
  0x6f   : > { %s434_s18 = scalar_lea.hbm %s635_s8, 128  ;;  %s438_s25 = scalar_lea.hbm %s679_s2, 256 }
  0x70   : > { %p435_p5 = scmp.ne.s32.totalorder %s635_s8, %s434_s18  ;;  %p439_p0 = scmp.lt.u32.totalorder %s635_s8, %s679_s2 }
  0x71   : > { %p440_p1 = scmp.lt.u32.totalorder %s438_s25, %s434_s18  ;;  %p442_p6 = scmp.lt.u32.totalorder %s434_s18, %s635_s8 }
  0x72   : > { %p436_p8 = pnand %p435_p5, %p688_p11 }
  0x73   : > { %p441_p3 = por %p440_p1, %p439_p0 }
  0x74   : > { %p437_p9 = pneg %p436_p8 }
  0x75   : > { %p443_p12 = por %p442_p6, %p441_p3 }
  0x77   : > { %p444_p13 = pnand %p443_p12, %p437_p9 }
  0x79   : > { %447 = shalt.err (!%p444_p13)
}
  0x7a   : > { %346 = dma.vmem_to_hbm [thread:$0]  (%p688_p11), %s630_s4, 128, %s635_s8, %s248_s9  }
  0x7b PF: > { %s273_s28 = sand.u32 1, %s474_s11   ;;  %p689_p7 = scmp.ne.s32.totalorder %s684_s23, 0 }
  0x7c   : > { %p690_p10 = scmp.ge.s32.totalorder %s486_s14, 2  ;;  %s274_s29 = scalar_lea.sflag [#allocation5], %s273_s28 }
  0x7e   : > { %p353_p2 = pnand %p690_p10, %p689_p7 }
  0x80   : > { %469 = dma.done.wait (!%p353_p2), %s274_s29, 128  }
  0x81   : > { %471 = vsyncadd (!%p353_p2), %s274_s29, 4294967168  ;;  %p16_p4 = scmp.ge.s32.totalorder %s533_s16, 4   ;;  %s691_s11 = smov %s478_s12 }
  0x82   : > { %s692_s12 = smov %s482_s13  ;;  %s693_s13 = smov %s545_s19 }
  0x83   : > { %s694_s14 = smov %s533_s16  ;;  %18 = sbr.rel (!%p16_p4) target bundleno = 7 (0x7), region = 73 }
  0x8a   :  { %279 = vsyncpa [#allocation4], 1 }
  0x8b   :  { %281 = vsyncpa [#allocation4 + $0x1], 1 }
  0x8c   :  { %282 = vsyncpa [#allocation5], 1 }
  0x8d   :  { %284 = vsyncpa [#allocation5 + $0x1], 1 }

</bundles_post_ra>
